<compile_context>
chip_gen: v7x
topology: tpu7x:2x2x1
jax: 0.10.0
libtpu: 0.0.40
codegen_flags: <defaults>
</compile_context>

<pallas_src>
import jax
import jax.numpy as jnp
from jax.experimental import pallas as pl
from jax.experimental.pallas import tpu as pltpu

IN_FEATURES = 512
HIDDEN = 256
NUM_CLASSES = 10
LANE = 128
# Lane-dense padded width for the second layer / output (>= NUM_CLASSES).
C_PAD = ((NUM_CLASSES + LANE - 1) // LANE) * LANE  # = 128


def mlp_kernel(x_ref, w1_ref, b1_ref, w2_ref, b2_ref, o_ref):
    # x_ref : [TM, 512] f32/bf16   w1_ref: [512, 256] bf16   b1_ref: [1, 256] f32
    # w2_ref: [256, 128] bf16      b2_ref: [1, 128]   f32    o_ref : [TM, 128] f32
    x = x_ref[...].astype(jnp.bfloat16)                     # VPU cast (free-ish)
    h = jnp.dot(x, w1_ref[...], preferred_element_type=jnp.float32)
    h = jnp.maximum(h + b1_ref[...], 0.0)                   # bias + ReLU in f32
    y = jnp.dot(h.astype(jnp.bfloat16), w2_ref[...],
                preferred_element_type=jnp.float32)
    o_ref[...] = (y + b2_ref[...]).astype(o_ref.dtype)


def _round_up(n, m):
    return ((n + m - 1) // m) * m


def model_b_forward(x, w1, b1, w2p, b2p):
    """x: [B, 512] f32 (or bf16). w1: [512,256] bf16, b1: [1,256] f32,
    w2p: [256, C_PAD] bf16 (zero-padded), b2p: [1, C_PAD] f32 (zero-padded)."""
    B = x.shape[0]
    # Batch tile: big enough that each grid step's DMA amortizes the ~0.35 us
    # per-step overhead, small enough to keep >=2 steps for v7x megacore.
    if B >= 1024:
        tile_m = 512
    elif B >= 256:
        tile_m = 256
    else:
        tile_m = max(8, _round_up(B, 8))
    b_pad = pl.cdiv(B, tile_m) * tile_m

    xk = x
    if b_pad != B:
        xk = jnp.pad(xk, ((0, b_pad - B), (0, 0)))

    grid = (b_pad // tile_m,)

    x_bytes = xk.size * xk.dtype.itemsize
    flops = 2 * b_pad * (IN_FEATURES * HIDDEN + HIDDEN * C_PAD)
    bytes_accessed = (x_bytes + w1.size * 2 + w2p.size * 2
                      + b1.size * 4 + b2p.size * 4 + b_pad * C_PAD * 4)

    out = pl.pallas_call(
        mlp_kernel,
        out_shape=jax.ShapeDtypeStruct((b_pad, C_PAD), jnp.float32),
        grid=grid,
        in_specs=[
            # x: tiled along batch (double-buffered by the pipeline)
            pl.BlockSpec((tile_m, IN_FEATURES), lambda i: (i, 0)),
            # weights/biases: block index constant -> fetched once, VMEM-resident
            pl.BlockSpec((IN_FEATURES, HIDDEN), lambda i: (0, 0)),
            pl.BlockSpec((1, HIDDEN), lambda i: (0, 0)),
            pl.BlockSpec((HIDDEN, C_PAD), lambda i: (0, 0)),
            pl.BlockSpec((1, C_PAD), lambda i: (0, 0)),
        ],
        out_specs=pl.BlockSpec((tile_m, C_PAD), lambda i: (i, 0)),
        compiler_params=pltpu.CompilerParams(
            dimension_semantics=("parallel",)),
        cost_estimate=pl.CostEstimate(
            flops=flops, transcendentals=0, bytes_accessed=bytes_accessed),
    )(xk, w1, b1, w2p, b2p)

    # Strip batch padding and the lane padding of the class dimension.
    return out[:B, :NUM_CLASSES]


def init_params(key):
    # PyTorch nn.Linear-style init: U(-1/sqrt(fan_in), 1/sqrt(fan_in)).
    # Weights stored transposed ([in, out]) and cast to bf16 (halves weight
    # DMA, native MXU path); biases kept f32 (added post-accumulation).
    # Second layer zero-padded to C_PAD lanes so the output store is lane-dense.
    k1, k2, k3, k4 = jax.random.split(key, 4)
    bound1 = 1.0 / jnp.sqrt(IN_FEATURES)
    bound2 = 1.0 / jnp.sqrt(HIDDEN)
    w1 = jax.random.uniform(k1, (IN_FEATURES, HIDDEN), jnp.float32, -bound1, bound1)
    b1 = jax.random.uniform(k2, (1, HIDDEN), jnp.float32, -bound1, bound1)
    w2 = jax.random.uniform(k3, (HIDDEN, NUM_CLASSES), jnp.float32, -bound2, bound2)
    b2 = jax.random.uniform(k4, (1, NUM_CLASSES), jnp.float32, -bound2, bound2)

    w2p = jnp.zeros((HIDDEN, C_PAD), jnp.float32).at[:, :NUM_CLASSES].set(w2)
    b2p = jnp.zeros((1, C_PAD), jnp.float32).at[:, :NUM_CLASSES].set(b2)
    return w1.astype(jnp.bfloat16), b1, w2p.astype(jnp.bfloat16), b2p


if __name__ == "__main__":
    key = jax.random.PRNGKey(0)
    k_x, k_p = jax.random.split(key)

    batch = 8
    x = jax.random.normal(k_x, (batch, IN_FEATURES), jnp.float32)
    w1, b1, w2p, b2p = init_params(k_p)

    out = model_b_forward(x, w1, b1, w2p, b2p)
    out = jax.block_until_ready(out)
    assert out.shape == (batch, NUM_CLASSES), out.shape

    # Pure-JAX reference with matching bf16-matmul / f32-accumulate semantics.
    h_ref = jnp.dot(x.astype(jnp.bfloat16), w1,
                    preferred_element_type=jnp.float32) + b1
    h_ref = jnp.maximum(h_ref, 0.0)
    y_ref = jnp.dot(h_ref.astype(jnp.bfloat16), w2p,
                    preferred_element_type=jnp.float32) + b2p
    ref = y_ref[:, :NUM_CLASSES]
    assert jnp.allclose(out, ref, atol=2e-3, rtol=2e-3), "mismatch vs reference"

    print("KERNEL_OK")
</pallas_src>

<mosaic_0001>
module attributes {stable_mosaic.version = 11 : i64} {
  func.func @mlp_kernel(%arg0: i32, %arg1: memref<8x512xf32, #tpu.memory_space<vmem>>, %arg2: memref<512x256xbf16, #tpu.memory_space<vmem>>, %arg3: memref<1x256xf32, #tpu.memory_space<vmem>>, %arg4: memref<256x128xbf16, #tpu.memory_space<vmem>>, %arg5: memref<1x128xf32, #tpu.memory_space<vmem>>, %arg6: memref<8x128xf32, #tpu.memory_space<vmem>>) attributes {dimension_semantics = [#tpu.dimension_semantics<parallel>], iteration_bounds = array<i64: 1>, scalar_prefetch = 0 : i64, scratch_operands = 0 : i64, tpu.core_type = #tpu.core_type<tc>, window_params = [{transform_indices = @transform_0, window_bounds = array<i64: 8, 512>}, {pipeline_mode = #tpu.pipeline_mode<synchronous>, transform_indices = @transform_1, window_bounds = array<i64: 512, 256>}, {pipeline_mode = #tpu.pipeline_mode<synchronous>, transform_indices = @transform_2, window_bounds = array<i64: 1, 256>}, {pipeline_mode = #tpu.pipeline_mode<synchronous>, transform_indices = @transform_3, window_bounds = array<i64: 256, 128>}, {pipeline_mode = #tpu.pipeline_mode<synchronous>, transform_indices = @transform_4, window_bounds = array<i64: 1, 128>}, {transform_indices = @transform_5, window_bounds = array<i64: 8, 128>}]} {
    %c0 = arith.constant 0 : index
    %c0_0 = arith.constant 0 : index
    %0 = vector.load %arg1[%c0, %c0_0] : memref<8x512xf32, #tpu.memory_space<vmem>>, vector<8x512xf32>
    %1 = arith.truncf %0 : vector<8x512xf32> to vector<8x512xbf16>
    %c0_1 = arith.constant 0 : index
    %c0_2 = arith.constant 0 : index
    %2 = vector.load %arg2[%c0_1, %c0_2] : memref<512x256xbf16, #tpu.memory_space<vmem>>, vector<512x256xbf16>
    %cst = arith.constant dense<0.000000e+00> : vector<8x256xf32>
    %3 = tpu.matmul %1, %2, %cst {dimension_numbers = #tpu.dot_dimension_numbers<[1], [0], [0], [1], [0, 0, 1, 1], [], []>} : vector<8x512xbf16>, vector<512x256xbf16>, vector<8x256xf32> -> vector<8x256xf32>
    %c0_3 = arith.constant 0 : index
    %c0_4 = arith.constant 0 : index
    %4 = vector.load %arg3[%c0_3, %c0_4] : memref<1x256xf32, #tpu.memory_space<vmem>>, vector<1x256xf32>
    %5 = vector.broadcast %4 : vector<1x256xf32> to vector<8x256xf32>
    %6 = arith.addf %3, %5 : vector<8x256xf32>
    %cst_5 = arith.constant 0.000000e+00 : f32
    %7 = vector.broadcast %cst_5 : f32 to vector<8x256xf32>
    %8 = arith.maximumf %6, %7 : vector<8x256xf32>
    %9 = arith.truncf %8 : vector<8x256xf32> to vector<8x256xbf16>
    %c0_6 = arith.constant 0 : index
    %c0_7 = arith.constant 0 : index
    %10 = vector.load %arg4[%c0_6, %c0_7] : memref<256x128xbf16, #tpu.memory_space<vmem>>, vector<256x128xbf16>
    %cst_8 = arith.constant dense<0.000000e+00> : vector<8x128xf32>
    %11 = tpu.matmul %9, %10, %cst_8 {dimension_numbers = #tpu.dot_dimension_numbers<[1], [0], [0], [1], [0, 0, 1, 1], [], []>} : vector<8x256xbf16>, vector<256x128xbf16>, vector<8x128xf32> -> vector<8x128xf32>
    %c0_9 = arith.constant 0 : index
    %c0_10 = arith.constant 0 : index
    %12 = vector.load %arg5[%c0_9, %c0_10] : memref<1x128xf32, #tpu.memory_space<vmem>>, vector<1x128xf32>
    %13 = vector.broadcast %12 : vector<1x128xf32> to vector<8x128xf32>
    %14 = arith.addf %11, %13 : vector<8x128xf32>
    %c0_11 = arith.constant 0 : index
    %c0_12 = arith.constant 0 : index
    %15 = vector.load %arg6[%c0_11, %c0_12] : memref<8x128xf32, #tpu.memory_space<vmem>>, vector<8x128xf32>
    tpu.vector_store %arg6[%c0_11, %c0_12], %14 {strides = array<i32>} : memref<8x128xf32, #tpu.memory_space<vmem>>, vector<8x128xf32>,
    return
  }
  func.func @transform_0(%arg0: i32) -> (i32, i32) {
    %c0_i32 = arith.constant 0 : i32
    %c0_i32_0 = arith.constant 0 : i32
    return %arg0, %c0_i32 : i32, i32
  }
  func.func @transform_1(%arg0: i32) -> (i32, i32) {
    %c0_i32 = arith.constant 0 : i32
    %c0_i32_0 = arith.constant 0 : i32
    %c0_i32_1 = arith.constant 0 : i32
    return %c0_i32, %c0_i32_0 : i32, i32
  }
  func.func @transform_2(%arg0: i32) -> (i32, i32) {
    %c0_i32 = arith.constant 0 : i32
    %c0_i32_0 = arith.constant 0 : i32
    %c0_i32_1 = arith.constant 0 : i32
    return %c0_i32, %c0_i32_0 : i32, i32
  }
  func.func @transform_3(%arg0: i32) -> (i32, i32) {
    %c0_i32 = arith.constant 0 : i32
    %c0_i32_0 = arith.constant 0 : i32
    %c0_i32_1 = arith.constant 0 : i32
    return %c0_i32, %c0_i32_0 : i32, i32
  }
  func.func @transform_4(%arg0: i32) -> (i32, i32) {
    %c0_i32 = arith.constant 0 : i32
    %c0_i32_0 = arith.constant 0 : i32
    %c0_i32_1 = arith.constant 0 : i32
    return %c0_i32, %c0_i32_0 : i32, i32
  }
  func.func @transform_5(%arg0: i32) -> (i32, i32) {
    %c0_i32 = arith.constant 0 : i32
    %c0_i32_0 = arith.constant 0 : i32
    return %arg0, %c0_i32 : i32, i32
  }
}

</mosaic_0001>

<bundles_post_ra>
// kernel: tpu_custom_call.1
= control target key start
LH: loop header
LB: loop body
LE: loop exit
PB: predicated region body
PF: predicated region fallthrough
CT: control target
= control target key end

     0   :  { %10 = vsyncpa [#allocation3], 0  ;;  %s1156_s0 = inlined_call_operand.hbm [shape: f32[8,512], index: 0, kind: input, shape index: {}]   ;;  %s1157_s1 = inlined_call_operand.hbm [shape: bf16[512,256], index: 1, kind: input, shape index: {}]   ;;  %s1158_s2 = inlined_call_operand.vmem [shape: f32[1,256], index: 2, kind: input, shape index: {}]   ;;  %s1159_s3 = inlined_call_operand.hbm [shape: bf16[256,128], index: 3, kind: input, shape index: {}]   ;;  %s1160_s4 = inlined_call_operand.vmem [shape: f32[1,128], index: 4, kind: input, shape index: {}]   ;;  %s1161_s5 = inlined_call_operand.hbm [shape: f32[8,128], index: 5, kind: output, shape index: {}]  }
   0x1   :  { %11 = vsyncpa [#allocation6], 0 }
   0x2   :  { %12 = vsyncpa [#allocation4], 0  ;;  %s1064_s18 = smov [#allocation5]   ;;  %s970_s22 = scalar_lea.hbm %s1157_s1, 8192 }
   0x3   :  { %s28_s19 = sshll.u32 %s1064_s18, 4  ;;  %p971_p0 = scmp.ne.s32.totalorder %s1157_s1, %s970_s22  ;;  %s29_s19 = int_to_ptr.vmem [resolvable:$true] %s28_s19 }
   0x4   :  { %p974_p1 = scmp.lt.u32.totalorder %s970_s22, %s1157_s1 }
   0x6   :  { %p976_p2 = pnand %p974_p1, %p971_p0 }
   0x8   :  { %979 = shalt.err (!%p976_p2)
}
   0x9   :  { %s980_s27 = scalar_lea.vmem %s29_s19, 8192  ;;  %p985_p4 = scmp.lt.s32.totalorder %s29_s19, %s29_s19 }
   0xa   :  { %p981_p3 = scmp.ne.s32.totalorder %s29_s19, %s980_s27  ;;  %p986_p5 = scmp.lt.s32.totalorder %s980_s27, %s980_s27 }
   0xc   :  { %p987_p6 = por %p986_p5, %p985_p4 }
   0xe   :  { %p988_p7 = pnand %p987_p6, %p981_p3 }
  0x10   :  { %991 = shalt.err (!%p988_p7)
}
  0x11   :  { %s1065_s28 = smov 128   ;;  %s1066_s29 = smov 8  }
  0x12   :  { %34 = dma.hbm_to_vmem [thread:$0]  %s1157_s1, 8192, %s29_s19, [#allocation6], %s1065_s28, %s1065_s28, %s1066_s29  }
  0x13   :  { %s1067_s7 = smov [#allocation2]   ;;  %s1068_s9 = smov [#allocation7]  }
  0x14   :  { %s19_s8 = sshll.u32 %s1067_s7, 4  ;;  %s42_s10 = sshll.u32 %s1068_s9, 4  ;;  %s20_s8 = int_to_ptr.vmem [resolvable:$true] %s19_s8  ;;  %s43_s10 = int_to_ptr.vmem [resolvable:$true] %s42_s10 }
  0x15   :  { %s992_s13 = scalar_lea.hbm %s1156_s0, 512 }
  0x16   :  { %p993_p8 = scmp.ne.s32.totalorder %s1156_s0, %s992_s13  ;;  %p996_p9 = scmp.lt.u32.totalorder %s992_s13, %s1156_s0 }
  0x18   :  { %p998_p10 = pnand %p996_p9, %p993_p8 }
  0x1a   :  { %1001 = shalt.err (!%p998_p10)
}
  0x1b   :  { %s1002_s1 = scalar_lea.vmem %s20_s8, 512  ;;  %p1007_p12 = scmp.lt.s32.totalorder %s20_s8, %s20_s8 }
  0x1c   :  { %p1003_p11 = scmp.ne.s32.totalorder %s20_s8, %s1002_s1  ;;  %p1008_p13 = scmp.lt.s32.totalorder %s1002_s1, %s1002_s1 }
  0x1e   :  { %p1009_p0 = por %p1008_p13, %p1007_p12 }
  0x20   :  { %p1010_p1 = pnand %p1009_p0, %p1003_p11 }
  0x22   :  { %1013 = shalt.err (!%p1010_p1)
}
  0x23   :  { %22 = dma.hbm_to_vmem [thread:$0]  %s1156_s0, 512, %s20_s8, [#allocation3]  }
  0x24   :  { %s1014_s22 = scalar_lea.hbm %s1159_s3, 2048 }
  0x25   :  { %p1015_p2 = scmp.ne.s32.totalorder %s1159_s3, %s1014_s22  ;;  %p1018_p3 = scmp.lt.u32.totalorder %s1014_s22, %s1159_s3 }
  0x27   :  { %p1020_p4 = pnand %p1018_p3, %p1015_p2 }
  0x29   :  { %1023 = shalt.err (!%p1020_p4)
}
  0x2a   :  { %s1024_s27 = scalar_lea.vmem %s43_s10, 2048  ;;  %p1029_p6 = scmp.lt.s32.totalorder %s43_s10, %s43_s10 }
  0x2b   :  { %p1025_p5 = scmp.ne.s32.totalorder %s43_s10, %s1024_s27  ;;  %p1030_p7 = scmp.lt.s32.totalorder %s1024_s27, %s1024_s27 }
  0x2d   :  { %p1031_p8 = por %p1030_p7, %p1029_p6 }
  0x2f   :  { %p1032_p9 = pnand %p1031_p8, %p1025_p5 }
  0x31   :  { %1035 = shalt.err (!%p1032_p9)
}
  0x32   :  { %s1069_s0 = smov 64   ;;  %s1070_s28 = smov 4  }
  0x33   :  { %48 = dma.hbm_to_vmem [thread:$0]  %s1159_s3, 2048, %s43_s10, [#allocation6], %s1069_s0, %s1069_s0, %s1070_s28  }
  0x34   :  { %1058 = dma.done.wait [#allocation3], 512  }
  0x35   :  { %1059 = vsyncadd [#allocation3], 4294966784 }
  0x36   :  { %1060 = dma.done.wait [#allocation6], 10240  }
  0x37   :  { %1061 = vsyncadd [#allocation6], 4294957056  ;;  %v858_v0 = vld [vmem:[#allocation5 + $0x4] ss:$8 sps:$4 sm:$0xff]   ;;  %v862_v2 = vld [vmem:[#allocation5] ss:$8 sps:$4 sm:$0xff]  }
  0x38   :  { %v860_v1 = vld [vmem:[#allocation5 + $0x104] ss:$8 sps:$4 sm:$0xff]   ;;  %465 = vmatprep.subr.bf16.mxu1 %v858_v0  ;;  %v863_v3 = vld [vmem:[#allocation5 + $0x100] ss:$8 sps:$4 sm:$0xff]   ;;  %v864_v4 = vld [vmem:[#allocation5 + $0x14] ss:$8 sps:$4 sm:$0xff]  }
  0x39   :  { %506 = vmatprep.subr.bf16.mxu0 %v860_v1  ;;  %466 = vmatpush1.bf16.msra.mxu1 %v862_v2  ;;  %v866_v5 = vld [vmem:[#allocation5 + $0x114] ss:$8 sps:$4 sm:$0xff]   ;;  %v868_v6 = vld [vmem:[#allocation5 + $0x10] ss:$8 sps:$4 sm:$0xff]   ;;  %v870_v8 = vld [vmem:[#allocation5 + $0x24] ss:$8 sps:$4 sm:$0xff]  }
  0x3a   :  { %507 = vmatpush1.bf16.msra.mxu0 %v863_v3  ;;  %467 = vmatprep.subr.bf16.mxu1 %v864_v4  ;;  %v869_v7 = vld [vmem:[#allocation5 + $0x110] ss:$8 sps:$4 sm:$0xff]   ;;  %v872_v9 = vld [vmem:[#allocation5 + $0x124] ss:$8 sps:$4 sm:$0xff]   ;;  %v874_v10 = vld [vmem:[#allocation5 + $0x20] ss:$8 sps:$4 sm:$0xff]  }
  0x3b   :  { %508 = vmatprep.subr.bf16.mxu0 %v866_v5  ;;  %v875_v11 = vld [vmem:[#allocation5 + $0x120] ss:$8 sps:$4 sm:$0xff]   ;;  %v876_v12 = vld [vmem:[#allocation5 + $0x34] ss:$8 sps:$4 sm:$0xff]   ;;  %v880_v14 = vld [vmem:[#allocation5 + $0x30] ss:$8 sps:$4 sm:$0xff]  }
  0x3c   :  { %v878_v13 = vld [vmem:[#allocation5 + $0x134] ss:$8 sps:$4 sm:$0xff]   ;;  %v881_v15 = vld [vmem:[#allocation5 + $0x130] ss:$8 sps:$4 sm:$0xff]   ;;  %v882_v16 = vld [vmem:[#allocation5 + $0x44] ss:$8 sps:$4 sm:$0xff]  }
  0x3d   :  { %468 = vmatpush1.bf16.msra.mxu1 %v868_v6  ;;  %v884_v17 = vld [vmem:[#allocation5 + $0x144] ss:$8 sps:$4 sm:$0xff]   ;;  %v886_v18 = vld [vmem:[#allocation5 + $0x40] ss:$8 sps:$4 sm:$0xff]   ;;  %v888_v20 = vld [vmem:[#allocation5 + $0x54] ss:$8 sps:$4 sm:$0xff]  }
  0x3e   :  { %509 = vmatpush1.bf16.msra.mxu0 %v869_v7  ;;  %469 = vmatprep.subr.bf16.mxu1 %v870_v8  ;;  %v887_v19 = vld [vmem:[#allocation5 + $0x140] ss:$8 sps:$4 sm:$0xff]   ;;  %v890_v21 = vld [vmem:[#allocation5 + $0x154] ss:$8 sps:$4 sm:$0xff]   ;;  %v892_v22 = vld [vmem:[#allocation5 + $0x50] ss:$8 sps:$4 sm:$0xff]  }
  0x3f   :  { %510 = vmatprep.subr.bf16.mxu0 %v872_v9  ;;  %v893_v23 = vld [vmem:[#allocation5 + $0x150] ss:$8 sps:$4 sm:$0xff]   ;;  %v894_v24 = vld [vmem:[#allocation5 + $0x64] ss:$8 sps:$4 sm:$0xff]   ;;  %v898_v26 = vld [vmem:[#allocation5 + $0x60] ss:$8 sps:$4 sm:$0xff]  }
  0x40   :  { %v896_v25 = vld [vmem:[#allocation5 + $0x164] ss:$8 sps:$4 sm:$0xff]   ;;  %v899_v27 = vld [vmem:[#allocation5 + $0x160] ss:$8 sps:$4 sm:$0xff]   ;;  %v900_v28 = vld [vmem:[#allocation5 + $0x74] ss:$8 sps:$4 sm:$0xff]  }
  0x41   :  { %470 = vmatpush1.bf16.msra.mxu1 %v874_v10  ;;  %v902_v29 = vld [vmem:[#allocation5 + $0x174] ss:$8 sps:$4 sm:$0xff]   ;;  %v904_v30 = vld [vmem:[#allocation5 + $0x70] ss:$8 sps:$4 sm:$0xff]   ;;  %v906_v32 = vld [vmem:[#allocation5 + $0x84] ss:$8 sps:$4 sm:$0xff]  }
  0x42   :  { %511 = vmatpush1.bf16.msra.mxu0 %v875_v11  ;;  %471 = vmatprep.subr.bf16.mxu1 %v876_v12  ;;  %v905_v31 = vld [vmem:[#allocation5 + $0x170] ss:$8 sps:$4 sm:$0xff]   ;;  %v908_v33 = vld [vmem:[#allocation5 + $0x184] ss:$8 sps:$4 sm:$0xff]   ;;  %v910_v34 = vld [vmem:[#allocation5 + $0x80] ss:$8 sps:$4 sm:$0xff]  }
  0x43   :  { %512 = vmatprep.subr.bf16.mxu0 %v878_v13  ;;  %v911_v35 = vld [vmem:[#allocation5 + $0x180] ss:$8 sps:$4 sm:$0xff]   ;;  %v912_v36 = vld [vmem:[#allocation5 + $0x94] ss:$8 sps:$4 sm:$0xff]   ;;  %v916_v38 = vld [vmem:[#allocation5 + $0x90] ss:$8 sps:$4 sm:$0xff]  }
  0x44   :  { %v914_v37 = vld [vmem:[#allocation5 + $0x194] ss:$8 sps:$4 sm:$0xff]   ;;  %v917_v39 = vld [vmem:[#allocation5 + $0x190] ss:$8 sps:$4 sm:$0xff]   ;;  %v918_v40 = vld [vmem:[#allocation5 + $0xa4] ss:$8 sps:$4 sm:$0xff]  }
  0x45   :  { %472 = vmatpush1.bf16.msra.mxu1 %v880_v14  ;;  %v920_v41 = vld [vmem:[#allocation5 + $0x1a4] ss:$8 sps:$4 sm:$0xff]   ;;  %v922_v42 = vld [vmem:[#allocation5 + $0xa0] ss:$8 sps:$4 sm:$0xff]   ;;  %v924_v44 = vld [vmem:[#allocation5 + $0xb4] ss:$8 sps:$4 sm:$0xff]  }
  0x46   :  { %513 = vmatpush1.bf16.msra.mxu0 %v881_v15  ;;  %473 = vmatprep.subr.bf16.mxu1 %v882_v16  ;;  %v923_v43 = vld [vmem:[#allocation5 + $0x1a0] ss:$8 sps:$4 sm:$0xff]   ;;  %v926_v45 = vld [vmem:[#allocation5 + $0x1b4] ss:$8 sps:$4 sm:$0xff]   ;;  %v928_v47 = vld [vmem:[#allocation5 + $0xb0] ss:$8 sps:$4 sm:$0xff]  }
  0x47   :  { %514 = vmatprep.subr.bf16.mxu0 %v884_v17  ;;  %v62_v46 = vld [vmem:[#allocation2 + $0x8] sm:$0xff]  ;;  %v929_v48 = vld [vmem:[#allocation5 + $0x1b0] ss:$8 sps:$4 sm:$0xff]   ;;  %v936_v56 = vld [vmem:[#allocation5 + $0xd4] ss:$8 sps:$4 sm:$0xff]   ;;  %s1071_s8 = smov [#allocation8]  }
  0x48   :  { %v66_v49 = vpack.c.bf16 %v62_v46, %v62_v46  ;;  %v64_v50 = vld [vmem:[#allocation2 + $0x18] sm:$0xff]  ;;  %v930_v51 = vld [vmem:[#allocation5 + $0xc4] ss:$8 sps:$4 sm:$0xff]   ;;  %v934_v54 = vld [vmem:[#allocation5 + $0xc0] ss:$8 sps:$4 sm:$0xff]   ;;  %s733_s9 = sshll.u32 %s1071_s8, 4  ;;  %s734_s9 = int_to_ptr.vmem [resolvable:$true] %s733_s9 }
  0x49   :  { %474 = vmatpush1.bf16.msra.mxu1 %v886_v18  ;;  %v68_v52 = vpack.c.bf16 %v64_v50, %v64_v50  ;;  %v932_v53 = vld [vmem:[#allocation5 + $0x1c4] ss:$8 sps:$4 sm:$0xff]   ;;  %v935_v55 = vld [vmem:[#allocation5 + $0x1c0] ss:$8 sps:$4 sm:$0xff]   ;;  %v938_v57 = vld [vmem:[#allocation5 + $0x1d4] ss:$8 sps:$4 sm:$0xff]   ;;  %p1041_p11 = scmp.lt.s32.totalorder %s734_s9, %s734_s9 }
  0x4a   :  { %515 = vmatpush1.bf16.msra.mxu0 %v887_v19  ;;  %475 = vmatprep.subr.bf16.mxu1 %v888_v20  ;;  %v940_v58 = vld [vmem:[#allocation5 + $0xd0] ss:$8 sps:$4 sm:$0xff]   ;;  %v942_v60 = vld [vmem:[#allocation5 + $0xe4] ss:$8 sps:$4 sm:$0xff]   ;;  %v946_v62 = vld [vmem:[#allocation5 + $0xe0] ss:$8 sps:$4 sm:$0xff]  }
  0x4b   :  { %516 = vmatprep.subr.bf16.mxu0 %v890_v21  ;;  %497 = vmatprep.mubr.bf16.mxu1 %v66_v49  ;;  %v941_v59 = vld [vmem:[#allocation5 + $0x1d0] ss:$8 sps:$4 sm:$0xff]   ;;  %v944_v61 = vld [vmem:[#allocation5 + $0x1e4] ss:$8 sps:$4 sm:$0xff]   ;;  %v947_v63 = vld [vmem:[#allocation5 + $0x1e0] ss:$8 sps:$4 sm:$0xff]  }
  0x4c   :  { %538 = vmatprep.mubr.bf16.mxu0 %v68_v52  ;;  %v948_v0 = vld [vmem:[#allocation5 + $0xf4] ss:$8 sps:$4 sm:$0xff]   ;;  %v952_v2 = vld [vmem:[#allocation5 + $0xf0] ss:$8 sps:$4 sm:$0xff]   ;;  %v61_v4 = vld [vmem:[#allocation2] sm:$0xff]  ;;  %s1036_s10 = scalar_lea.vmem %s734_s9, 128 }
  0x4d   :  { %476 = vmatpush1.bf16.msra.mxu1 %v892_v22  ;;  %v950_v1 = vld [vmem:[#allocation5 + $0x1f4] ss:$8 sps:$4 sm:$0xff]   ;;  %v953_v3 = vld [vmem:[#allocation5 + $0x1f0] ss:$8 sps:$4 sm:$0xff]   ;;  %v954_v6 = vld [vmem:[#allocation7 + $0x40] sm:$0xff]   ;;  %v65_v7 = vpack.c.bf16 %v61_v4, %v61_v4  ;;  %p1037_p10 = scmp.ne.s32.totalorder %s734_s9, %s1036_s10  ;;  %p1042_p12 = scmp.lt.s32.totalorder %s1036_s10, %s1036_s10 }
  0x4e   :  { %517 = vmatpush1.bf16.msra.mxu0 %v893_v23  ;;  %477 = vmatprep.subr.bf16.mxu1 %v894_v24  ;;  %v63_v5 = vld [vmem:[#allocation2 + $0x10] sm:$0xff]  ;;  %v955_v9 = vld [vmem:[#allocation7] sm:$0xff]   ;;  %v956_v10 = vld [vmem:[#allocation7 + $0x48] sm:$0xff]   ;;  %v135_v24 = vlaneseq }
  0x4f   :  { %518 = vmatprep.subr.bf16.mxu0 %v896_v25  ;;  %v67_v8 = vpack.c.bf16 %v63_v5, %v63_v5  ;;  %v957_v11 = vld [vmem:[#allocation7 + $0x8] sm:$0xff]   ;;  %v958_v12 = vld [vmem:[#allocation7 + $0x50] sm:$0xff]   ;;  %v960_v14 = vld [vmem:[#allocation7 + $0x58] sm:$0xff]   ;;  %p1043_p13 = por %p1042_p12, %p1041_p11 }
  0x50   :  { %v959_v13 = vld [vmem:[#allocation7 + $0x10] sm:$0xff]   ;;  %v961_v15 = vld [vmem:[#allocation7 + $0x18] sm:$0xff]   ;;  %v962_v16 = vld [vmem:[#allocation7 + $0x60] sm:$0xff]   ;;  %v136_v25 = vshrl.u32 %v135_v24, 7 }
  0x51   :  { %478 = vmatpush1.bf16.msra.mxu1 %v898_v26  ;;  %v963_v17 = vld [vmem:[#allocation7 + $0x20] sm:$0xff]   ;;  %v964_v18 = vld [vmem:[#allocation7 + $0x68] sm:$0xff]   ;;  %v966_v20 = vld [vmem:[#allocation7 + $0x70] sm:$0xff]   ;;  %p1044_p0 = pnand %p1043_p13, %p1037_p10 }
  0x52   :  { %519 = vmatpush1.bf16.msra.mxu0 %v899_v27  ;;  %479 = vmatprep.subr.bf16.mxu1 %v900_v28  ;;  %v965_v19 = vld [vmem:[#allocation7 + $0x28] sm:$0xff]   ;;  %v967_v21 = vld [vmem:[#allocation7 + $0x30] sm:$0xff]   ;;  %v968_v22 = vld [vmem:[#allocation7 + $0x78] sm:$0xff]   ;;  %v137_v26 = vsub.s32 0, %v136_v25  ;;  %v141_v28 = vsub.s32 1, %v136_v25 }
  0x53   :  { %520 = vmatprep.subr.bf16.mxu0 %v902_v29  ;;  %v969_v23 = vld [vmem:[#allocation7 + $0x38] sm:$0xff]   ;;  %v133_v27 = vld [vmem:[%s1158_s2] sm:$0x3] }
  0x54   :  { %v138_v29 = vrot.slane %v133_v27, %v137_v26 }
  0x55   :  { %480 = vmatpush1.bf16.msra.mxu1 %v904_v30  ;;  %v142_v30 = vrot.slane %v133_v27, %v141_v28 }
  0x56   :  { %521 = vmatpush1.bf16.msra.mxu0 %v905_v31  ;;  %481 = vmatprep.subr.bf16.mxu1 %v906_v32 }
  0x57   :  { %522 = vmatprep.subr.bf16.mxu0 %v908_v33 }
  0x59   :  { %482 = vmatpush1.bf16.msra.mxu1 %v910_v34 }
  0x5a   :  { %523 = vmatpush1.bf16.msra.mxu0 %v911_v35  ;;  %483 = vmatprep.subr.bf16.mxu1 %v912_v36 }
  0x5b   :  { %524 = vmatprep.subr.bf16.mxu0 %v914_v37 }
  0x5d   :  { %484 = vmatpush1.bf16.msra.mxu1 %v916_v38 }
  0x5e   :  { %525 = vmatpush1.bf16.msra.mxu0 %v917_v39  ;;  %485 = vmatprep.subr.bf16.mxu1 %v918_v40 }
  0x5f   :  { %526 = vmatprep.subr.bf16.mxu0 %v920_v41 }
  0x61   :  { %486 = vmatpush1.bf16.msra.mxu1 %v922_v42 }
  0x62   :  { %527 = vmatpush1.bf16.msra.mxu0 %v923_v43  ;;  %487 = vmatprep.subr.bf16.mxu1 %v924_v44 }
  0x63   :  { %528 = vmatprep.subr.bf16.mxu0 %v926_v45 }
  0x65   :  { %488 = vmatpush1.bf16.msra.mxu1 %v928_v47 }
  0x66   :  { %529 = vmatpush1.bf16.msra.mxu0 %v929_v48  ;;  %489 = vmatprep.subr.bf16.mxu1 %v930_v51  ;;  %v807_v48 = vld [vmem:[%s1160_s4] ss:$0 sm:$0xff] }
  0x67   :  { %530 = vmatprep.subr.bf16.mxu0 %v932_v53 }
  0x69   :  { %490 = vmatpush1.bf16.msra.mxu1 %v934_v54 }
  0x6a   :  { %531 = vmatpush1.bf16.msra.mxu0 %v935_v55  ;;  %491 = vmatprep.subr.bf16.mxu1 %v936_v56 }
  0x6b   :  { %532 = vmatprep.subr.bf16.mxu0 %v938_v57 }
  0x6d   :  { %492 = vmatpush1.bf16.msra.mxu1 %v940_v58 }
  0x6e   :  { %533 = vmatpush1.bf16.msra.mxu0 %v941_v59  ;;  %493 = vmatprep.subr.bf16.mxu1 %v942_v60 }
  0x6f   :  { %534 = vmatprep.subr.bf16.mxu0 %v944_v61 }
  0x71   :  { %494 = vmatpush1.bf16.msra.mxu1 %v946_v62 }
  0x72   :  { %535 = vmatpush1.bf16.msra.mxu0 %v947_v63  ;;  %495 = vmatprep.subr.bf16.mxu1 %v948_v0 }
  0x73   :  { %536 = vmatprep.subr.bf16.mxu0 %v950_v1 }
  0x75   :  { %496 = vmatpush1.bf16.msra.mxu1 %v952_v2 }
  0x76   :  { %537 = vmatpush1.bf16.msra.mxu0 %v953_v3  ;;  %824 = vmatprep.subr.bf16.mxu1 %v954_v6 }
  0x78   :  { %498 = vmatmul.mubr.bf16.vlgmr.msra.gmra.mrb[0].mxu1 %v65_v7 }
  0x79   :  { %539 = vmatmul.mubr.bf16.vlgmr.msra.gmra.mrb[0].mxu0 %v67_v8  ;;  %825 = vmatpush3.bf16.msra.mxu1 %v955_v9 }
  0x7a   :  { %826 = vmatprep.subr.bf16.mxu1 %v956_v10 }
  0x7d   :  { %827 = vmatpush3.bf16.msra.mxu1 %v957_v11 }
  0x7e   :  { %828 = vmatprep.subr.bf16.mxu1 %v958_v12 }
  0x81   :  { %829 = vmatpush3.bf16.msra.mxu1 %v959_v13 }
  0x82   :  { %830 = vmatprep.subr.bf16.mxu1 %v960_v14 }
  0x85   :  { %831 = vmatpush3.bf16.msra.mxu1 %v961_v15 }
  0x86   :  { %832 = vmatprep.subr.bf16.mxu1 %v962_v16 }
  0x89   :  { %833 = vmatpush3.bf16.msra.mxu1 %v963_v17 }
  0x8a   :  { %834 = vmatprep.subr.bf16.mxu1 %v964_v18 }
  0x8d   :  { %835 = vmatpush3.bf16.msra.mxu1 %v965_v19 }
  0x8e   :  { %836 = vmatprep.subr.bf16.mxu1 %v966_v20 }
  0x91   :  { %837 = vmatpush3.bf16.msra.mxu1 %v967_v21 }
  0x92   :  { %838 = vmatprep.subr.bf16.mxu1 %v968_v22 }
  0x95   :  { %839 = vmatpush3.bf16.msra.mxu1 %v969_v23 }
 0x14b   :  { %v499_v31 = vpop.f32.mrb[0].mxu1 }
 0x14c   :  { %v540_v32 = vpop.f32.mrb[0].mxu0  ;;  %v500_v33 = vadd.f32 %v499_v31, %v138_v29  ;;  %v501_v34 = vpop.f32.mrb[1].mxu1 }
 0x14d   :  { %v542_v35 = vpop.f32.mrb[1].mxu0  ;;  %v502_v36 = vadd.f32 %v501_v34, %v142_v30  ;;  %v503_v37 = vpop.f32.mrb[2].mxu1 }
 0x14e   :  { %v544_v38 = vpop.f32.mrb[2].mxu0  ;;  %v541_v39 = vadd.f32 %v540_v32, %v500_v33  ;;  %v504_v40 = vpop.f32.mrb[3].mxu1 }
 0x14f   :  { %v545_v41 = vpop.f32.mrb[3].mxu0  ;;  %v543_v42 = vadd.f32 %v542_v35, %v502_v36 }
 0x150   :  { %v547_v43 = vmax.f32 %v541_v39, 0.0 }
 0x151   :  { %v548_v44 = vmax.f32 %v543_v42, 0.0 }
 0x152   :  { %v549_v46 = vpack.c.bf16 %v547_v43, %v547_v43 }
 0x153   :  { %v550_v45 = vpack.c.bf16 %v548_v44, %v548_v44 }
 0x155   :  { %718 = vmatprep.mubr.bf16.mxu1 %v550_v45 }
 0x156   :  { %719 = vmatmul.mubr.bf16.vlgmr.msra.gmra.mrb[4].mxu1 %v549_v46 }
 0x229   :  { %v840_v47 = vpop.f32.mrb[4].mxu1 }
 0x22a   :  { %v841_v49 = vpop.f32.mrb[5].mxu1 }
 0x22b   :  { %v842_v50 = vadd.f32 %v841_v49, %v840_v47  ;;  %v843_v51 = vpop.f32.mrb[6].mxu1 }
 0x22c   :  { %v844_v52 = vpop.f32.mrb[7].mxu1 }
 0x22d   :  { %v721_v53 = vadd.f32 %v842_v50, %v807_v48 }
 0x22f   :  { %726 = vst [vmem:[#allocation8] sm:$0xff] %v721_v53 }
 0x230   :  { %1047 = shalt.err (!%p1044_p0)
}
 0x231   :  { %s1048_s4 = scalar_lea.hbm %s1161_s5, 128 }
 0x232   :  { %p1049_p1 = scmp.ne.s32.totalorder %s1161_s5, %s1048_s4  ;;  %p1052_p2 = scmp.lt.u32.totalorder %s1048_s4, %s1161_s5 }
 0x234   :  { %p1054_p3 = pnand %p1052_p2, %p1049_p1 }
 0x236   :  { %1057 = shalt.err (!%p1054_p3)
}
 0x237   :  { %736 = dma.vmem_to_hbm [thread:$0]  %s734_s9, 128, %s1161_s5, [#allocation4]  }
 0x238   :  { %1062 = dma.done.wait [#allocation4], 128  }
 0x239   :  { %1063 = vsyncadd [#allocation4], 4294967168 }
 0x23a   :  { %740 = vsyncpa [#allocation3], 1 }
 0x23b   :  { %741 = vsyncpa [#allocation6], 1 }
 0x23c   :  { %742 = vsyncpa [#allocation4], 1 }

</bundles_post_ra>
